<compile_context>
chip_gen: v6e
topology: v6e:2x2x1
jax: 0.10.0
libtpu: 0.0.40
codegen_flags: <defaults>
</compile_context>

<pallas_src>
import functools

import jax
import jax.numpy as jnp
from jax.experimental import pallas as pl
from jax.experimental.pallas import tpu as pltpu


def _round_up(x: int, m: int) -> int:
    return ((x + m - 1) // m) * m


# --------------------------------------------------------------------------- #
# Kernel
# --------------------------------------------------------------------------- #
def actor_kernel(x_ref, w_ref, b_ref, o_ref, *, s_pad: int, lane: int, a: int):
    """One batch tile: 3 matmuls + 2 ReLUs + masked-by-bias softmax, fused.

    Only the `a` real action lanes are stored (o_ref is (TB, a))."""
    cdt = w_ref.dtype                      # matmul compute dtype (bf16 or f32)
    x = x_ref[...].astype(cdt)             # (TB, s_pad)
    b = b_ref[...]                         # (3, lane) f32 biases (row 2 pads = -1e30)

    # Static, sublane-aligned views into the resident weight slab.
    w1 = w_ref[0:s_pad, :]                            # (s_pad, lane)
    w2 = w_ref[s_pad:s_pad + lane, :]                 # (lane,  lane)
    w3 = w_ref[s_pad + lane:s_pad + 2 * lane, :]      # (lane,  lane)

    # fc1 + ReLU   (f32 accumulation, f32 elementwise)
    h1 = jnp.dot(x, w1, preferred_element_type=jnp.float32) + b[0:1, :]
    h1 = jnp.maximum(h1, 0.0)
    # fc2 + ReLU
    h2 = jnp.dot(h1.astype(cdt), w2, preferred_element_type=jnp.float32) + b[1:2, :]
    h2 = jnp.maximum(h2, 0.0)
    # fc3 -> logits; padded action lanes get -1e30 from the packed bias.
    logits = jnp.dot(h2.astype(cdt), w3, preferred_element_type=jnp.float32) + b[2:3, :]

    # Softmax over the lane (action) axis. Padded lanes -> exp(-1e30 - m) == 0.
    m = jnp.max(logits, axis=-1, keepdims=True)
    e = jnp.exp(logits - m)
    denom = jnp.sum(e, axis=-1, keepdims=True)
    probs = e * pl.reciprocal(denom, approx=True)     # divide on the EUP slot
    o_ref[...] = probs[:, :a].astype(o_ref.dtype)     # store only real action lanes


# --------------------------------------------------------------------------- #
# Parameter packing (done once; weights stored as (in_features, out_features))
# --------------------------------------------------------------------------- #
def pack_actor_params(params, *, matmul_dtype=jnp.bfloat16):
    """Pack w1/w2/w3 into one lane-padded slab and b1/b2/b3 into one (3, LANE) slab.

    bf16 matmul operands are the default (native MXU rate on v5e/v6e/v7x);
    biases stay f32 (required for the -1e30 padded-lane softmax mask)."""
    w1, w2, w3 = params["w1"], params["w2"], params["w3"]
    b1, b2, b3 = params["b1"], params["b2"], params["b3"]
    S, H = w1.shape
    A = w3.shape[1]
    assert H <= 1024 and A <= 1024
    LANE = _round_up(max(H, A, 128), 128)   # common lane width (>=128 -> lane-dense)
    S_PAD = _round_up(max(S, 8), 8)         # sublane-aligned state rows

    def pad2(w, rows, cols):
        w = w.astype(matmul_dtype)
        return jnp.pad(w, ((0, rows - w.shape[0]), (0, cols - w.shape[1])))

    w_slab = jnp.concatenate(
        [pad2(w1, S_PAD, LANE), pad2(w2, LANE, LANE), pad2(w3, LANE, LANE)], axis=0
    )  # (S_PAD + 2*LANE, LANE)

    b1p = jnp.pad(b1.astype(jnp.float32), (0, LANE - H))
    b2p = jnp.pad(b2.astype(jnp.float32), (0, LANE - H))
    # Padded action lanes carry -1e30 so softmax ignores them (exp -> 0).
    b3p = jnp.pad(b3.astype(jnp.float32), (0, LANE - A), constant_values=-1e30)
    b_slab = jnp.stack([b1p, b2p, b3p], axis=0)  # (3, LANE), must remain f32

    meta = {"S": S, "H": H, "A": A, "S_PAD": S_PAD, "LANE": LANE}
    return w_slab, b_slab, meta


# --------------------------------------------------------------------------- #
# Wrapper
# --------------------------------------------------------------------------- #
def actor_forward(x, w_slab, b_slab, meta, *, block_b: int = 1024):
    """x: (B, state_size) f32 -> (B, action_size) softmax probabilities (f32)."""
    B, S = x.shape
    S_PAD, LANE, A = meta["S_PAD"], meta["LANE"], meta["A"]

    if S < S_PAD:
        # Feature-dim zero pad only (tiny; the expensive batch-dim pad is gone --
        # ragged last batch tiles are clipped by Pallas instead).
        x = jnp.pad(x, ((0, 0), (0, S_PAD - S)))

    # Batch tile: multiple of 8, capped at 2048 to stay VMEM-friendly on v7x
    # (64 MiB physical / 32 MiB scoped) and keep >=2 tiles per TensorCore.
    TB = min(_round_up(min(block_b, 2048), 8), _round_up(B, 8))
    num_tiles = pl.cdiv(B, TB)

    kernel = functools.partial(actor_kernel, s_pad=S_PAD, lane=LANE, a=A)

    def call(single_buffer_params: bool):
        def param_spec(shape):
            # Constant-index resident blocks don't need double buffering.
            if single_buffer_params:
                return pl.BlockSpec(shape, lambda i: (0, 0),
                                    pipeline_mode=pl.Buffered(1))
            return pl.BlockSpec(shape, lambda i: (0, 0))

        return pl.pallas_call(
            kernel,
            out_shape=jax.ShapeDtypeStruct((B, A), jnp.float32),
            grid_spec=pltpu.PrefetchScalarGridSpec(
                num_scalar_prefetch=0,
                grid=(num_tiles,),
                in_specs=[
                    pl.BlockSpec((TB, S_PAD), lambda i: (i, 0)),  # x tile (pipelined)
                    param_spec(w_slab.shape),                     # weights resident
                    param_spec(b_slab.shape),                     # biases resident
                ],
                # Last dim == full array dim -> legal block; only real action
                # lanes are DMA'd back to HBM (32x less writeback than padded).
                out_specs=pl.BlockSpec((TB, A), lambda i: (i, 0)),
            ),
            compiler_params=pltpu.CompilerParams(
                dimension_semantics=("parallel",),   # batch tiles across TCs (v7x)
                vmem_limit_bytes=32 * 1024 * 1024,   # safe on v5e/v6e/v7x
            ),
        )(x, w_slab, b_slab)

    try:
        return call(True)
    except Exception:
        # pipeline_mode=pl.Buffered(1) not supported by this jax build; the
        # resident params are tiny, so plain double-buffered specs are fine.
        return call(False)


# --------------------------------------------------------------------------- #
# Init + reference
# --------------------------------------------------------------------------- #
def init_actor_params(key, state_size, action_size, hidden_size):
    """Mirrors nn.Linear default init U(-1/sqrt(fan_in), 1/sqrt(fan_in)).
    Weights stored as (in_features, out_features); biases as (out_features,)."""
    def linear_init(k, fan_in, fan_out):
        kw, kb = jax.random.split(k)
        bound = 1.0 / jnp.sqrt(jnp.float32(fan_in))
        w = jax.random.uniform(kw, (fan_in, fan_out), jnp.float32, -bound, bound)
        b = jax.random.uniform(kb, (fan_out,), jnp.float32, -bound, bound)
        return w, b

    k1, k2, k3 = jax.random.split(key, 3)
    w1, b1 = linear_init(k1, state_size, hidden_size)
    w2, b2 = linear_init(k2, hidden_size, hidden_size)
    w3, b3 = linear_init(k3, hidden_size, action_size)
    return {"w1": w1, "b1": b1, "w2": w2, "b2": b2, "w3": w3, "b3": b3}


def actor_reference(x, params):
    h1 = jnp.maximum(x @ params["w1"] + params["b1"], 0.0)
    h2 = jnp.maximum(h1 @ params["w2"] + params["b2"], 0.0)
    logits = h2 @ params["w3"] + params["b3"]
    return jax.nn.softmax(logits, axis=1)


# --------------------------------------------------------------------------- #
if __name__ == "__main__":
    state_size, action_size, hidden_size = 8, 4, 32
    batch = 8

    key = jax.random.PRNGKey(0)
    k_params, k_x, k_x2 = jax.random.split(key, 3)
    params = init_actor_params(k_params, state_size, action_size, hidden_size)
    x = jax.random.normal(k_x, (batch, state_size), jnp.float32)
    ref = actor_reference(x, params)

    # f32 matmul operands (tolerance accounts for the EUP approx reciprocal).
    w32, b32, m32 = pack_actor_params(params, matmul_dtype=jnp.float32)
    out = jax.block_until_ready(actor_forward(x, w32, b32, m32))
    assert out.shape == (batch, action_size), out.shape
    assert jnp.allclose(out, ref, atol=5e-3, rtol=5e-3), (out, ref)
    assert jnp.allclose(jnp.sum(out, axis=1), 1.0, atol=5e-3)

    # Default path: bf16 matmul operands (native MXU rate on v5e/v6e/v7x),
    # f32 accumulation / elementwise.
    w16, b16, m16 = pack_actor_params(params)
    out16 = jax.block_until_ready(actor_forward(x, w16, b16, m16))
    assert out16.shape == (batch, action_size)
    assert jnp.allclose(out16, ref, atol=3e-2, rtol=3e-2), (out16, ref)

    # Ragged multi-tile grid: B not a multiple of TB, no wrapper-side batch pad;
    # Pallas clips the last tile's input/output DMAs.
    x2 = jax.random.normal(k_x2, (50, state_size), jnp.float32)
    ref2 = actor_reference(x2, params)
    out2 = jax.block_until_ready(actor_forward(x2, w32, b32, m32, block_b=16))
    assert out2.shape == (50, action_size)
    assert jnp.allclose(out2, ref2, atol=5e-3, rtol=5e-3), (out2, ref2)

    print("KERNEL_OK")
</pallas_src>

<mosaic_0001>
module attributes {stable_mosaic.version = 11 : i64} {
  func.func @actor_kernel(%arg0: i32, %arg1: memref<8x8xf32, #tpu.memory_space<vmem>>, %arg2: memref<264x128xf32, #tpu.memory_space<vmem>>, %arg3: memref<3x128xf32, #tpu.memory_space<vmem>>, %arg4: memref<8x4xf32, #tpu.memory_space<vmem>>) attributes {dimension_semantics = [#tpu.dimension_semantics<parallel>], iteration_bounds = array<i64: 1>, scalar_prefetch = 0 : i64, scratch_operands = 0 : i64, tpu.core_type = #tpu.core_type<tc>, window_params = [{transform_indices = @transform_0, window_bounds = array<i64: 8, 8>}, {pipeline_mode = #tpu.pipeline_mode<synchronous>, transform_indices = @transform_1, window_bounds = array<i64: 264, 128>}, {pipeline_mode = #tpu.pipeline_mode<synchronous>, transform_indices = @transform_2, window_bounds = array<i64: 3, 128>}, {transform_indices = @transform_3, window_bounds = array<i64: 8, 4>}]} {
    %c0 = arith.constant 0 : index
    %c0_0 = arith.constant 0 : index
    %0 = vector.load %arg1[%c0, %c0_0] : memref<8x8xf32, #tpu.memory_space<vmem>>, vector<8x8xf32>
    %c0_1 = arith.constant 0 : index
    %c0_2 = arith.constant 0 : index
    %1 = vector.load %arg3[%c0_1, %c0_2] : memref<3x128xf32, #tpu.memory_space<vmem>>, vector<3x128xf32>
    %c0_3 = arith.constant 0 : index
    %c0_4 = arith.constant 0 : index
    %2 = vector.load %arg2[%c0_3, %c0_4] : memref<264x128xf32, #tpu.memory_space<vmem>>, vector<8x128xf32>
    %c8 = arith.constant 8 : index
    %c0_5 = arith.constant 0 : index
    %3 = vector.load %arg2[%c8, %c0_5] : memref<264x128xf32, #tpu.memory_space<vmem>>, vector<128x128xf32>
    %c136 = arith.constant 136 : index
    %c0_6 = arith.constant 0 : index
    %4 = vector.load %arg2[%c136, %c0_6] : memref<264x128xf32, #tpu.memory_space<vmem>>, vector<128x128xf32>
    %cst = arith.constant dense<0.000000e+00> : vector<8x128xf32>
    %5 = tpu.matmul %0, %2, %cst {dimension_numbers = #tpu.dot_dimension_numbers<[1], [0], [0], [1], [0, 0, 1, 1], [], []>} : vector<8x8xf32>, vector<8x128xf32>, vector<8x128xf32> -> vector<8x128xf32>
    %6 = vector.extract_strided_slice %1 {offsets = [0, 0], sizes = [1, 128], strides = [1, 1]} : vector<3x128xf32> to vector<1x128xf32>
    %7 = vector.broadcast %6 : vector<1x128xf32> to vector<8x128xf32>
    %8 = arith.addf %5, %7 : vector<8x128xf32>
    %cst_7 = arith.constant 0.000000e+00 : f32
    %9 = vector.broadcast %cst_7 : f32 to vector<8x128xf32>
    %10 = arith.maximumf %8, %9 : vector<8x128xf32>
    %cst_8 = arith.constant dense<0.000000e+00> : vector<8x128xf32>
    %11 = tpu.matmul %10, %3, %cst_8 {dimension_numbers = #tpu.dot_dimension_numbers<[1], [0], [0], [1], [0, 0, 1, 1], [], []>} : vector<8x128xf32>, vector<128x128xf32>, vector<8x128xf32> -> vector<8x128xf32>
    %12 = vector.extract_strided_slice %1 {offsets = [1, 0], sizes = [1, 128], strides = [1, 1]} : vector<3x128xf32> to vector<1x128xf32>
    %13 = vector.broadcast %12 : vector<1x128xf32> to vector<8x128xf32>
    %14 = arith.addf %11, %13 : vector<8x128xf32>
    %cst_9 = arith.constant 0.000000e+00 : f32
    %15 = vector.broadcast %cst_9 : f32 to vector<8x128xf32>
    %16 = arith.maximumf %14, %15 : vector<8x128xf32>
    %cst_10 = arith.constant dense<0.000000e+00> : vector<8x128xf32>
    %17 = tpu.matmul %16, %4, %cst_10 {dimension_numbers = #tpu.dot_dimension_numbers<[1], [0], [0], [1], [0, 0, 1, 1], [], []>} : vector<8x128xf32>, vector<128x128xf32>, vector<8x128xf32> -> vector<8x128xf32>
    %18 = vector.extract_strided_slice %1 {offsets = [2, 0], sizes = [1, 128], strides = [1, 1]} : vector<3x128xf32> to vector<1x128xf32>
    %19 = vector.broadcast %18 : vector<1x128xf32> to vector<8x128xf32>
    %20 = arith.addf %17, %19 : vector<8x128xf32>
    %cst_11 = arith.constant dense<0xFF800000> : vector<8xf32>
    %21 = vector.multi_reduction <maximumf>, %20, %cst_11 [1] : vector<8x128xf32> to vector<8xf32>
    %22 = vector.shape_cast %21 : vector<8xf32> to vector<8x1xf32>
    %23 = vector.broadcast %22 : vector<8x1xf32> to vector<8x128xf32>
    %24 = arith.subf %20, %23 : vector<8x128xf32>
    %25 = math.exp %24 : vector<8x128xf32>
    %cst_12 = arith.constant dense<0.000000e+00> : vector<8xf32>
    %26 = vector.multi_reduction <add>, %25, %cst_12 [1] : vector<8x128xf32> to vector<8xf32>
    %27 = vector.shape_cast %26 : vector<8xf32> to vector<8x1xf32>
    %28 = tpu.reciprocal %27 {approx = true} : vector<8x1xf32> -> vector<8x1xf32>
    %29 = vector.broadcast %28 : vector<8x1xf32> to vector<8x128xf32>
    %30 = arith.mulf %25, %29 : vector<8x128xf32>
    %31 = vector.extract_strided_slice %30 {offsets = [0, 0], sizes = [8, 4], strides = [1, 1]} : vector<8x128xf32> to vector<8x4xf32>
    %c0_13 = arith.constant 0 : index
    %c0_14 = arith.constant 0 : index
    %32 = vector.load %arg4[%c0_13, %c0_14] : memref<8x4xf32, #tpu.memory_space<vmem>>, vector<8x4xf32>
    tpu.vector_store %arg4[%c0_13, %c0_14], %31 {strides = array<i32>} : memref<8x4xf32, #tpu.memory_space<vmem>>, vector<8x4xf32>,
    return
  }
  func.func @transform_0(%arg0: i32) -> (i32, i32) {
    %c0_i32 = arith.constant 0 : i32
    %c0_i32_0 = arith.constant 0 : i32
    return %arg0, %c0_i32 : i32, i32
  }
  func.func @transform_1(%arg0: i32) -> (i32, i32) {
    %c0_i32 = arith.constant 0 : i32
    %c0_i32_0 = arith.constant 0 : i32
    %c0_i32_1 = arith.constant 0 : i32
    return %c0_i32, %c0_i32_0 : i32, i32
  }
  func.func @transform_2(%arg0: i32) -> (i32, i32) {
    %c0_i32 = arith.constant 0 : i32
    %c0_i32_0 = arith.constant 0 : i32
    %c0_i32_1 = arith.constant 0 : i32
    return %c0_i32, %c0_i32_0 : i32, i32
  }
  func.func @transform_3(%arg0: i32) -> (i32, i32) {
    %c0_i32 = arith.constant 0 : i32
    %c0_i32_0 = arith.constant 0 : i32
    return %arg0, %c0_i32 : i32, i32
  }
}

module attributes {stable_mosaic.version = 11 : i64} {
  func.func @actor_kernel(%arg0: i32, %arg1: memref<8x8xf32, #tpu.memory_space<vmem>>, %arg2: memref<264x128xf32, #tpu.memory_space<vmem>>, %arg3: memref<3x128xf32, #tpu.memory_space<vmem>>, %arg4: memref<8x4xf32, #tpu.memory_space<vmem>>) attributes {dimension_semantics = [#tpu.dimension_semantics<parallel>], iteration_bounds = array<i64: 1>, scalar_prefetch = 0 : i64, scratch_operands = 0 : i64, tpu.core_type = #tpu.core_type<tc>, window_params = [{transform_indices = @transform_0, window_bounds = array<i64: 8, 8>}, {pipeline_mode = #tpu.pipeline_mode<synchronous>, transform_indices = @transform_1, window_bounds = array<i64: 264, 128>}, {pipeline_mode = #tpu.pipeline_mode<synchronous>, transform_indices = @transform_2, window_bounds = array<i64: 3, 128>}, {transform_indices = @transform_3, window_bounds = array<i64: 8, 4>}]} {
    %c0 = arith.constant 0 : index
    %c0_0 = arith.constant 0 : index
    %0 = vector.load %arg1[%c0, %c0_0] : memref<8x8xf32, #tpu.memory_space<vmem>>, vector<8x8xf32>
    %c0_1 = arith.constant 0 : index
    %c0_2 = arith.constant 0 : index
    %1 = vector.load %arg3[%c0_1, %c0_2] : memref<3x128xf32, #tpu.memory_space<vmem>>, vector<3x128xf32>
    %c0_3 = arith.constant 0 : index
    %c0_4 = arith.constant 0 : index
    %2 = vector.load %arg2[%c0_3, %c0_4] : memref<264x128xf32, #tpu.memory_space<vmem>>, vector<8x128xf32>
    %c8 = arith.constant 8 : index
    %c0_5 = arith.constant 0 : index
    %3 = vector.load %arg2[%c8, %c0_5] : memref<264x128xf32, #tpu.memory_space<vmem>>, vector<128x128xf32>
    %c136 = arith.constant 136 : index
    %c0_6 = arith.constant 0 : index
    %4 = vector.load %arg2[%c136, %c0_6] : memref<264x128xf32, #tpu.memory_space<vmem>>, vector<128x128xf32>
    %cst = arith.constant dense<0.000000e+00> : vector<8x128xf32>
    %5 = tpu.matmul %0, %2, %cst {dimension_numbers = #tpu.dot_dimension_numbers<[1], [0], [0], [1], [0, 0, 1, 1], [], []>} : vector<8x8xf32>, vector<8x128xf32>, vector<8x128xf32> -> vector<8x128xf32>
    %6 = vector.extract_strided_slice %1 {offsets = [0, 0], sizes = [1, 128], strides = [1, 1]} : vector<3x128xf32> to vector<1x128xf32>
    %7 = vector.broadcast %6 : vector<1x128xf32> to vector<8x128xf32>
    %8 = arith.addf %5, %7 : vector<8x128xf32>
    %cst_7 = arith.constant 0.000000e+00 : f32
    %9 = vector.broadcast %cst_7 : f32 to vector<8x128xf32>
    %10 = arith.maximumf %8, %9 : vector<8x128xf32>
    %cst_8 = arith.constant dense<0.000000e+00> : vector<8x128xf32>
    %11 = tpu.matmul %10, %3, %cst_8 {dimension_numbers = #tpu.dot_dimension_numbers<[1], [0], [0], [1], [0, 0, 1, 1], [], []>} : vector<8x128xf32>, vector<128x128xf32>, vector<8x128xf32> -> vector<8x128xf32>
    %12 = vector.extract_strided_slice %1 {offsets = [1, 0], sizes = [1, 128], strides = [1, 1]} : vector<3x128xf32> to vector<1x128xf32>
    %13 = vector.broadcast %12 : vector<1x128xf32> to vector<8x128xf32>
    %14 = arith.addf %11, %13 : vector<8x128xf32>
    %cst_9 = arith.constant 0.000000e+00 : f32
    %15 = vector.broadcast %cst_9 : f32 to vector<8x128xf32>
    %16 = arith.maximumf %14, %15 : vector<8x128xf32>
    %cst_10 = arith.constant dense<0.000000e+00> : vector<8x128xf32>
    %17 = tpu.matmul %16, %4, %cst_10 {dimension_numbers = #tpu.dot_dimension_numbers<[1], [0], [0], [1], [0, 0, 1, 1], [], []>} : vector<8x128xf32>, vector<128x128xf32>, vector<8x128xf32> -> vector<8x128xf32>
    %18 = vector.extract_strided_slice %1 {offsets = [2, 0], sizes = [1, 128], strides = [1, 1]} : vector<3x128xf32> to vector<1x128xf32>
    %19 = vector.broadcast %18 : vector<1x128xf32> to vector<8x128xf32>
    %20 = arith.addf %17, %19 : vector<8x128xf32>
    %cst_11 = arith.constant dense<0xFF800000> : vector<8xf32>
    %21 = vector.multi_reduction <maximumf>, %20, %cst_11 [1] : vector<8x128xf32> to vector<8xf32>
    %22 = vector.shape_cast %21 : vector<8xf32> to vector<8x1xf32>
    %23 = vector.broadcast %22 : vector<8x1xf32> to vector<8x128xf32>
    %24 = arith.subf %20, %23 : vector<8x128xf32>
    %25 = math.exp %24 : vector<8x128xf32>
    %cst_12 = arith.constant dense<0.000000e+00> : vector<8xf32>
    %26 = vector.multi_reduction <add>, %25, %cst_12 [1] : vector<8x128xf32> to vector<8xf32>
    %27 = vector.shape_cast %26 : vector<8xf32> to vector<8x1xf32>
    %28 = tpu.reciprocal %27 {approx = true} : vector<8x1xf32> -> vector<8x1xf32>
    %29 = vector.broadcast %28 : vector<8x1xf32> to vector<8x128xf32>
    %30 = arith.mulf %25, %29 : vector<8x128xf32>
    %31 = vector.extract_strided_slice %30 {offsets = [0, 0], sizes = [8, 4], strides = [1, 1]} : vector<8x128xf32> to vector<8x4xf32>
    %c0_13 = arith.constant 0 : index
    %c0_14 = arith.constant 0 : index
    %32 = vector.load %arg4[%c0_13, %c0_14] : memref<8x4xf32, #tpu.memory_space<vmem>>, vector<8x4xf32>
    tpu.vector_store %arg4[%c0_13, %c0_14], %31 {strides = array<i32>} : memref<8x4xf32, #tpu.memory_space<vmem>>, vector<8x4xf32>,
    return
  }
  func.func @transform_0(%arg0: i32) -> (i32, i32) {
    %c0_i32 = arith.constant 0 : i32
    %c0_i32_0 = arith.constant 0 : i32
    return %arg0, %c0_i32 : i32, i32
  }
  func.func @transform_1(%arg0: i32) -> (i32, i32) {
    %c0_i32 = arith.constant 0 : i32
    %c0_i32_0 = arith.constant 0 : i32
    %c0_i32_1 = arith.constant 0 : i32
    return %c0_i32, %c0_i32_0 : i32, i32
  }
  func.func @transform_2(%arg0: i32) -> (i32, i32) {
    %c0_i32 = arith.constant 0 : i32
    %c0_i32_0 = arith.constant 0 : i32
    %c0_i32_1 = arith.constant 0 : i32
    return %c0_i32, %c0_i32_0 : i32, i32
  }
  func.func @transform_3(%arg0: i32) -> (i32, i32) {
    %c0_i32 = arith.constant 0 : i32
    %c0_i32_0 = arith.constant 0 : i32
    return %arg0, %c0_i32 : i32, i32
  }
}

</mosaic_0001>

<bundles_post_ra>
// kernel: tpu_custom_call.1
= control target key start
LH: loop header
LB: loop body
LE: loop exit
PB: predicated region body
PF: predicated region fallthrough
CT: control target
= control target key end

     0   :  { %8 = vsyncpa [#allocation3], 0  ;;  %s596_s0 = inlined_call_operand.hbm [shape: f32[8,8], index: 0, kind: input, shape index: {}]   ;;  %s597_s1 = inlined_call_operand.hbm [shape: f32[264,128], index: 1, kind: input, shape index: {}]   ;;  %s598_s2 = inlined_call_operand.hbm [shape: f32[3,128], index: 2, kind: input, shape index: {}]   ;;  %s599_s3 = inlined_call_operand.vmem [shape: f32[8,4], index: 3, kind: output, shape index: {}]  }
   0x1   :  { %9 = vsyncpa [#allocation5], 0  ;;  %s518_s12 = smov [#allocation4]  }
   0x2   :  { %s25_s13 = sshll.u32 %s518_s12, 4  ;;  %s26_s13 = int_to_ptr.vmem [resolvable:$true] %s25_s13 }
   0x3   :  { %s462_s14 = scalar_lea.vmem %s26_s13, 4224  ;;  %p467_p1 = scmp.lt.s32.totalorder %s26_s13, %s26_s13 }
   0x4   :  { %p463_p0 = scmp.ne.s32.totalorder %s26_s13, %s462_s14  ;;  %p468_p2 = scmp.lt.s32.totalorder %s462_s14, %s462_s14 }
   0x6   :  { %p469_p3 = por %p468_p2, %p467_p1 }
   0x8   :  { %p470_p4 = pnand %p469_p3, %p463_p0 }
   0xa   :  { %473 = shalt.err (!%p470_p4)
}
   0xb   :  { %s519_s15 = smov 128   ;;  %s520_s16 = smov 8  }
   0xc   :  { %31 = dma.hbm_to_vmem [thread:$0]  %s597_s1, 4224, %s26_s13, [#allocation5], %s519_s15, %s519_s15, %s520_s16  }
   0xd   :  { %s521_s19 = smov [#allocation2]   ;;  %s522_s21 = smov [#allocation6]  }
   0xe   :  { %s16_s20 = sshll.u32 %s521_s19, 4  ;;  %s38_s22 = sshll.u32 %s522_s21, 4  ;;  %s17_s20 = int_to_ptr.vmem [resolvable:$true] %s16_s20  ;;  %s39_s22 = int_to_ptr.vmem [resolvable:$true] %s38_s22 }
   0xf   :  { %s482_s23 = scalar_lea.vmem %s17_s20, 128  ;;  %p487_p6 = scmp.lt.s32.totalorder %s17_s20, %s17_s20 }
  0x10   :  { %p483_p5 = scmp.ne.s32.totalorder %s17_s20, %s482_s23  ;;  %p488_p7 = scmp.lt.s32.totalorder %s482_s23, %s482_s23 }
  0x12   :  { %p489_p8 = por %p488_p7, %p487_p6 }
  0x14   :  { %p490_p9 = pnand %p489_p8, %p483_p5 }
  0x16   :  { %493 = shalt.err (!%p490_p9)
}
  0x17   :  { %19 = dma.hbm_to_vmem [thread:$0]  %s596_s0, 128, %s17_s20, [#allocation3]  }
  0x18   :  { %s502_s26 = scalar_lea.vmem %s39_s22, 64  ;;  %p507_p11 = scmp.lt.s32.totalorder %s39_s22, %s39_s22 }
  0x19   :  { %p503_p10 = scmp.ne.s32.totalorder %s39_s22, %s502_s26  ;;  %p508_p12 = scmp.lt.s32.totalorder %s502_s26, %s502_s26 }
  0x1b   :  { %p509_p13 = por %p508_p12, %p507_p11 }
  0x1d   :  { %p510_p0 = pnand %p509_p13, %p503_p10 }
  0x1f   :  { %513 = shalt.err (!%p510_p0)
}
  0x20   :  { %41 = dma.hbm_to_vmem [thread:$0]  %s598_s2, 64, %s39_s22, [#allocation5]  }
  0x21   :  { %514 = dma.done.wait [#allocation3], 128  }
  0x22   :  { %515 = vsyncadd [#allocation3], 4294967168 }
  0x23   :  { %516 = dma.done.wait [#allocation5], 4288  }
  0x24   :  { %517 = vsyncadd [#allocation5], 4294963008  ;;  %v523_v0 = vmov 0.0   ;;  %vm524_vm0 = vmmov 0   ;;  %vm90_vm1 = vcmask 64512   ;;  %v53_v1 = vld [vmem:[#allocation4] sm:$0xff]  ;;  %v86_v32 = vlaneseq }
  0x25   :  { %368 = vmatprep.subr.mxu0 %v523_v0  ;;  %370 = vmatprep.mubr.msk.f32.mxu0 %vm524_vm0, %v523_v0  ;;  %v51_v2 = vld [vmem:[#allocation2] sm:$0xff]  ;;  %v69_v3 = vld [vmem:[#allocation4 + $0x80] sm:$0xff]  ;;  %v67_v5 = vld [vmem:[#allocation4 + $0x70] sm:$0xff]  ;;  %vm323_vm2 = vcmask 31744  }
  0x26   :  { %373 = vmatprep.subr.mxu1 %v523_v0  ;;  %405 = vmatprep.mubr.msk.f32.mxu1 %vm524_vm0, %v523_v0  ;;  %v68_v4 = vld [vmem:[#allocation4 + $0x78] sm:$0xff]  ;;  %v66_v6 = vld [vmem:[#allocation4 + $0x68] sm:$0xff]  ;;  %v65_v7 = vld [vmem:[#allocation4 + $0x60] sm:$0xff]  ;;  %v87_v33 = vshrl.u32 %v86_v32, 7 }
  0x27   :  { %369 = vmatpush3.msra.mxu0 %v53_v1  ;;  %374 = vmatpush3.msra.mxu1 %v69_v3  ;;  %v64_v8 = vld [vmem:[#allocation4 + $0x58] sm:$0xff]  ;;  %v63_v9 = vld [vmem:[#allocation4 + $0x50] sm:$0xff]  ;;  %v62_v10 = vld [vmem:[#allocation4 + $0x48] sm:$0xff] }
  0x28   :  { %371 = vmatmul.mubr.msk.f32.vlgmr.msra.gmra.mxu0 %vm90_vm1, %v51_v2  ;;  %375 = vmatprep.subr.mxu1 %v523_v0  ;;  %v61_v11 = vld [vmem:[#allocation4 + $0x40] sm:$0xff]  ;;  %v60_v12 = vld [vmem:[#allocation4 + $0x38] sm:$0xff]  ;;  %v59_v13 = vld [vmem:[#allocation4 + $0x30] sm:$0xff]  ;;  %v88_v34 = vsub.s32 0, %v87_v33  ;;  %v167_v44 = vsub.s32 1, %v87_v33  ;;  %v242_v50 = vsub.s32 2, %v87_v33 }
  0x29   :  { %376 = vmatpush3.msra.mxu1 %v68_v4  ;;  %408 = vmatprep.subr.mxu0 %v523_v0  ;;  %v58_v14 = vld [vmem:[#allocation4 + $0x28] sm:$0xff]  ;;  %v57_v15 = vld [vmem:[#allocation4 + $0x20] sm:$0xff]  ;;  %v56_v16 = vld [vmem:[#allocation4 + $0x18] sm:$0xff] }
  0x2a   :  { %377 = vmatprep.subr.mxu1 %v523_v0  ;;  %440 = vmatprep.mubr.msk.f32.mxu0 %vm524_vm0, %v523_v0  ;;  %v55_v17 = vld [vmem:[#allocation4 + $0x10] sm:$0xff]  ;;  %v54_v18 = vld [vmem:[#allocation4 + $0x8] sm:$0xff]  ;;  %v85_v19 = vld [vmem:[#allocation4 + $0x100] sm:$0xff] }
  0x2b   :  { %378 = vmatpush3.msra.mxu1 %v67_v5  ;;  %v84_v20 = vld [vmem:[#allocation4 + $0xf8] sm:$0xff]  ;;  %409 = vmatpush3.msra.mxu0 %v85_v19  ;;  %v83_v21 = vld [vmem:[#allocation4 + $0xf0] sm:$0xff]  ;;  %v82_v22 = vld [vmem:[#allocation4 + $0xe8] sm:$0xff] }
  0x2c   :  { %379 = vmatprep.subr.mxu1 %v523_v0  ;;  %410 = vmatprep.subr.mxu0 %v523_v0  ;;  %v81_v23 = vld [vmem:[#allocation4 + $0xe0] sm:$0xff]  ;;  %v80_v24 = vld [vmem:[#allocation4 + $0xd8] sm:$0xff]  ;;  %v79_v25 = vld [vmem:[#allocation4 + $0xd0] sm:$0xff] }
  0x2d   :  { %380 = vmatpush3.msra.mxu1 %v66_v6  ;;  %411 = vmatpush3.msra.mxu0 %v84_v20  ;;  %v78_v26 = vld [vmem:[#allocation4 + $0xc8] sm:$0xff]  ;;  %v77_v27 = vld [vmem:[#allocation4 + $0xc0] sm:$0xff]  ;;  %v76_v28 = vld [vmem:[#allocation4 + $0xb8] sm:$0xff] }
  0x2e   :  { %381 = vmatprep.subr.mxu1 %v523_v0  ;;  %412 = vmatprep.subr.mxu0 %v523_v0  ;;  %v75_v29 = vld [vmem:[#allocation4 + $0xb0] sm:$0xff]  ;;  %v74_v30 = vld [vmem:[#allocation4 + $0xa8] sm:$0xff]  ;;  %v73_v31 = vld [vmem:[#allocation4 + $0xa0] sm:$0xff] }
  0x2f   :  { %382 = vmatpush3.msra.mxu1 %v65_v7  ;;  %413 = vmatpush3.msra.mxu0 %v83_v21  ;;  %v52_v35 = vld [vmem:[#allocation6] sm:$0x7]  ;;  %v72_v41 = vld [vmem:[#allocation4 + $0x98] sm:$0xff]  ;;  %v71_v42 = vld [vmem:[#allocation4 + $0x90] sm:$0xff] }
  0x30   :  { %383 = vmatprep.subr.mxu1 %v523_v0  ;;  %414 = vmatprep.subr.mxu0 %v523_v0  ;;  %v89_v36 = vrot.slane %v52_v35, %v88_v34  ;;  %v70_v43 = vld [vmem:[#allocation4 + $0x88] sm:$0xff]  ;;  %v168_v45 = vrot.slane %v52_v35, %v167_v44  ;;  %v243_v51 = vrot.slane %v52_v35, %v242_v50 }
  0x31   :  { %384 = vmatpush3.msra.mxu1 %v64_v8  ;;  %415 = vmatpush3.msra.mxu0 %v82_v22 }
  0x32   :  { %385 = vmatprep.subr.mxu1 %v523_v0  ;;  %416 = vmatprep.subr.mxu0 %v523_v0 }
  0x33   :  { %386 = vmatpush3.msra.mxu1 %v63_v9  ;;  %417 = vmatpush3.msra.mxu0 %v81_v23 }
  0x34   :  { %387 = vmatprep.subr.mxu1 %v523_v0  ;;  %418 = vmatprep.subr.mxu0 %v523_v0 }
  0x35   :  { %388 = vmatpush3.msra.mxu1 %v62_v10  ;;  %419 = vmatpush3.msra.mxu0 %v80_v24 }
  0x36   :  { %389 = vmatprep.subr.mxu1 %v523_v0  ;;  %420 = vmatprep.subr.mxu0 %v523_v0 }
  0x37   :  { %390 = vmatpush3.msra.mxu1 %v61_v11  ;;  %421 = vmatpush3.msra.mxu0 %v79_v25 }
  0x38   :  { %391 = vmatprep.subr.mxu1 %v523_v0  ;;  %422 = vmatprep.subr.mxu0 %v523_v0 }
  0x39   :  { %392 = vmatpush3.msra.mxu1 %v60_v12  ;;  %423 = vmatpush3.msra.mxu0 %v78_v26 }
  0x3a   :  { %393 = vmatprep.subr.mxu1 %v523_v0  ;;  %424 = vmatprep.subr.mxu0 %v523_v0 }
  0x3b   :  { %394 = vmatpush3.msra.mxu1 %v59_v13  ;;  %425 = vmatpush3.msra.mxu0 %v77_v27 }
  0x3c   :  { %395 = vmatprep.subr.mxu1 %v523_v0  ;;  %426 = vmatprep.subr.mxu0 %v523_v0 }
  0x3d   :  { %396 = vmatpush3.msra.mxu1 %v58_v14  ;;  %427 = vmatpush3.msra.mxu0 %v76_v28 }
  0x3e   :  { %397 = vmatprep.subr.mxu1 %v523_v0  ;;  %428 = vmatprep.subr.mxu0 %v523_v0 }
  0x3f   :  { %398 = vmatpush3.msra.mxu1 %v57_v15  ;;  %429 = vmatpush3.msra.mxu0 %v75_v29 }
  0x40   :  { %399 = vmatprep.subr.mxu1 %v523_v0  ;;  %430 = vmatprep.subr.mxu0 %v523_v0 }
  0x41   :  { %400 = vmatpush3.msra.mxu1 %v56_v16  ;;  %431 = vmatpush3.msra.mxu0 %v74_v30 }
  0x42   :  { %401 = vmatprep.subr.mxu1 %v523_v0  ;;  %432 = vmatprep.subr.mxu0 %v523_v0 }
  0x43   :  { %402 = vmatpush3.msra.mxu1 %v55_v17  ;;  %433 = vmatpush3.msra.mxu0 %v73_v31 }
  0x44   :  { %403 = vmatprep.subr.mxu1 %v523_v0  ;;  %434 = vmatprep.subr.mxu0 %v523_v0 }
  0x45   :  { %404 = vmatpush3.msra.mxu1 %v54_v18  ;;  %435 = vmatpush3.msra.mxu0 %v72_v41 }
  0x46   :  { %436 = vmatprep.subr.mxu0 %v523_v0 }
  0x47   :  { %437 = vmatpush3.msra.mxu0 %v71_v42 }
  0x48   :  { %438 = vmatprep.subr.mxu0 %v523_v0 }
  0x49   :  { %439 = vmatpush3.msra.mxu0 %v70_v43 }
  0xe8   :  { %v160_v37 = vpop.f32.mrf.mxu0 }
  0xe9   :  { %v161_v38 = vadd.f32 %v160_v37, %v89_v36 }
  0xea   :  { %v372_v39 = vpop.f32.mrf.mxu0 }
  0xeb   :  { %v164_v40 = vmax.f32 %v161_v38, 0.0 }
  0xed   :  { %406 = vmatmul.mubr.f32.vlgmr.msra.gmra.mxu1 %v164_v40 }
 0x1ad   :  { %v235_v46 = vpop.f32.mrf.mxu1 }
 0x1ae   :  { %v236_v47 = vadd.f32 %v235_v46, %v168_v45 }
 0x1af   :  { %v407_v48 = vpop.f32.mrf.mxu1 }
 0x1b0   :  { %v239_v49 = vmax.f32 %v236_v47, 0.0 }
 0x1b2   :  { %441 = vmatmul.mubr.f32.vlgmr.msra.gmra.mxu0 %v239_v49 }
 0x272   :  { %v310_v52 = vpop.f32.mrf.mxu0 }
 0x273   :  { %v311_v53 = vadd.f32 %v310_v52, %v243_v51 }
 0x274   :  { %v442_v54 = vpop.f32.mrf.mxu0 }
 0x275   :  { %314 = vmax.xlane.f32.xlu0 %v311_v53 }
 0x2fe   :  { %v315_v55 = vpop.xlane.xlu0 %314 }
 0x2ff   :  { %v316_v56 = vsub.f32 %v311_v53, %v315_v55 }
 0x301   :  { %v317_v57 = vmul.f32 1.442695, %v316_v56 }
 0x303   :  { %450 = vpow2.f32 %v317_v57 }
 0x310   :  { %v451_v58 = vpop.eup %450 }
 0x311   :  { %319 = vadd.xlane.f32.xlu0 %v451_v58 }
 0x39a   :  { %v320_v59 = vpop.xlane.xlu0 %319 }
 0x39b   :  { %452 = vrcp.f32 %v320_v59 }
 0x3a8   :  { %v453_v60 = vpop.eup %452 }
 0x3a9   :  { %v322_v61 = vmul.f32 %v453_v60, %v451_v58 }
 0x3ab   :  { %324 = vst.msk [vmem:[%s599_s3] sm:$0xff] %vm323_vm2, %v322_v61 }
 0x3ac   :  { %329 = vsyncpa [#allocation3], 1 }
 0x3ad   :  { %330 = vsyncpa [#allocation5], 1 }

// kernel: tpu_custom_call.1
= control target key start
LH: loop header
LB: loop body
LE: loop exit
PB: predicated region body
PF: predicated region fallthrough
CT: control target
= control target key end

     0   :  { %8 = vsyncpa [#allocation3], 0  ;;  %s596_s0 = inlined_call_operand.hbm [shape: f32[8,8], index: 0, kind: input, shape index: {}]   ;;  %s597_s1 = inlined_call_operand.hbm [shape: f32[264,128], index: 1, kind: input, shape index: {}]   ;;  %s598_s2 = inlined_call_operand.hbm [shape: f32[3,128], index: 2, kind: input, shape index: {}]   ;;  %s599_s3 = inlined_call_operand.vmem [shape: f32[8,4], index: 3, kind: output, shape index: {}]  }
   0x1   :  { %9 = vsyncpa [#allocation5], 0  ;;  %s518_s12 = smov [#allocation4]  }
   0x2   :  { %s25_s13 = sshll.u32 %s518_s12, 4  ;;  %s26_s13 = int_to_ptr.vmem [resolvable:$true] %s25_s13 }
   0x3   :  { %s462_s14 = scalar_lea.vmem %s26_s13, 4224  ;;  %p467_p1 = scmp.lt.s32.totalorder %s26_s13, %s26_s13 }
   0x4   :  { %p463_p0 = scmp.ne.s32.totalorder %s26_s13, %s462_s14  ;;  %p468_p2 = scmp.lt.s32.totalorder %s462_s14, %s462_s14 }
   0x6   :  { %p469_p3 = por %p468_p2, %p467_p1 }
   0x8   :  { %p470_p4 = pnand %p469_p3, %p463_p0 }
   0xa   :  { %473 = shalt.err (!%p470_p4)
}
   0xb   :  { %s519_s15 = smov 128   ;;  %s520_s16 = smov 8  }
   0xc   :  { %31 = dma.hbm_to_vmem [thread:$0]  %s597_s1, 4224, %s26_s13, [#allocation5], %s519_s15, %s519_s15, %s520_s16  }
   0xd   :  { %s521_s19 = smov [#allocation2]   ;;  %s522_s21 = smov [#allocation6]  }
   0xe   :  { %s16_s20 = sshll.u32 %s521_s19, 4  ;;  %s38_s22 = sshll.u32 %s522_s21, 4  ;;  %s17_s20 = int_to_ptr.vmem [resolvable:$true] %s16_s20  ;;  %s39_s22 = int_to_ptr.vmem [resolvable:$true] %s38_s22 }
   0xf   :  { %s482_s23 = scalar_lea.vmem %s17_s20, 128  ;;  %p487_p6 = scmp.lt.s32.totalorder %s17_s20, %s17_s20 }
  0x10   :  { %p483_p5 = scmp.ne.s32.totalorder %s17_s20, %s482_s23  ;;  %p488_p7 = scmp.lt.s32.totalorder %s482_s23, %s482_s23 }
  0x12   :  { %p489_p8 = por %p488_p7, %p487_p6 }
  0x14   :  { %p490_p9 = pnand %p489_p8, %p483_p5 }
  0x16   :  { %493 = shalt.err (!%p490_p9)
}
  0x17   :  { %19 = dma.hbm_to_vmem [thread:$0]  %s596_s0, 128, %s17_s20, [#allocation3]  }
  0x18   :  { %s502_s26 = scalar_lea.vmem %s39_s22, 64  ;;  %p507_p11 = scmp.lt.s32.totalorder %s39_s22, %s39_s22 }
  0x19   :  { %p503_p10 = scmp.ne.s32.totalorder %s39_s22, %s502_s26  ;;  %p508_p12 = scmp.lt.s32.totalorder %s502_s26, %s502_s26 }
  0x1b   :  { %p509_p13 = por %p508_p12, %p507_p11 }
  0x1d   :  { %p510_p0 = pnand %p509_p13, %p503_p10 }
  0x1f   :  { %513 = shalt.err (!%p510_p0)
}
  0x20   :  { %41 = dma.hbm_to_vmem [thread:$0]  %s598_s2, 64, %s39_s22, [#allocation5]  }
  0x21   :  { %514 = dma.done.wait [#allocation3], 128  }
  0x22   :  { %515 = vsyncadd [#allocation3], 4294967168 }
  0x23   :  { %516 = dma.done.wait [#allocation5], 4288  }
  0x24   :  { %517 = vsyncadd [#allocation5], 4294963008  ;;  %v523_v0 = vmov 0.0   ;;  %vm524_vm0 = vmmov 0   ;;  %vm90_vm1 = vcmask 64512   ;;  %v53_v1 = vld [vmem:[#allocation4] sm:$0xff]  ;;  %v86_v32 = vlaneseq }
  0x25   :  { %368 = vmatprep.subr.mxu0 %v523_v0  ;;  %370 = vmatprep.mubr.msk.f32.mxu0 %vm524_vm0, %v523_v0  ;;  %v51_v2 = vld [vmem:[#allocation2] sm:$0xff]  ;;  %v69_v3 = vld [vmem:[#allocation4 + $0x80] sm:$0xff]  ;;  %v67_v5 = vld [vmem:[#allocation4 + $0x70] sm:$0xff]  ;;  %vm323_vm2 = vcmask 31744  }
  0x26   :  { %373 = vmatprep.subr.mxu1 %v523_v0  ;;  %405 = vmatprep.mubr.msk.f32.mxu1 %vm524_vm0, %v523_v0  ;;  %v68_v4 = vld [vmem:[#allocation4 + $0x78] sm:$0xff]  ;;  %v66_v6 = vld [vmem:[#allocation4 + $0x68] sm:$0xff]  ;;  %v65_v7 = vld [vmem:[#allocation4 + $0x60] sm:$0xff]  ;;  %v87_v33 = vshrl.u32 %v86_v32, 7 }
  0x27   :  { %369 = vmatpush3.msra.mxu0 %v53_v1  ;;  %374 = vmatpush3.msra.mxu1 %v69_v3  ;;  %v64_v8 = vld [vmem:[#allocation4 + $0x58] sm:$0xff]  ;;  %v63_v9 = vld [vmem:[#allocation4 + $0x50] sm:$0xff]  ;;  %v62_v10 = vld [vmem:[#allocation4 + $0x48] sm:$0xff] }
  0x28   :  { %371 = vmatmul.mubr.msk.f32.vlgmr.msra.gmra.mxu0 %vm90_vm1, %v51_v2  ;;  %375 = vmatprep.subr.mxu1 %v523_v0  ;;  %v61_v11 = vld [vmem:[#allocation4 + $0x40] sm:$0xff]  ;;  %v60_v12 = vld [vmem:[#allocation4 + $0x38] sm:$0xff]  ;;  %v59_v13 = vld [vmem:[#allocation4 + $0x30] sm:$0xff]  ;;  %v88_v34 = vsub.s32 0, %v87_v33  ;;  %v167_v44 = vsub.s32 1, %v87_v33  ;;  %v242_v50 = vsub.s32 2, %v87_v33 }
  0x29   :  { %376 = vmatpush3.msra.mxu1 %v68_v4  ;;  %408 = vmatprep.subr.mxu0 %v523_v0  ;;  %v58_v14 = vld [vmem:[#allocation4 + $0x28] sm:$0xff]  ;;  %v57_v15 = vld [vmem:[#allocation4 + $0x20] sm:$0xff]  ;;  %v56_v16 = vld [vmem:[#allocation4 + $0x18] sm:$0xff] }
  0x2a   :  { %377 = vmatprep.subr.mxu1 %v523_v0  ;;  %440 = vmatprep.mubr.msk.f32.mxu0 %vm524_vm0, %v523_v0  ;;  %v55_v17 = vld [vmem:[#allocation4 + $0x10] sm:$0xff]  ;;  %v54_v18 = vld [vmem:[#allocation4 + $0x8] sm:$0xff]  ;;  %v85_v19 = vld [vmem:[#allocation4 + $0x100] sm:$0xff] }
  0x2b   :  { %378 = vmatpush3.msra.mxu1 %v67_v5  ;;  %v84_v20 = vld [vmem:[#allocation4 + $0xf8] sm:$0xff]  ;;  %409 = vmatpush3.msra.mxu0 %v85_v19  ;;  %v83_v21 = vld [vmem:[#allocation4 + $0xf0] sm:$0xff]  ;;  %v82_v22 = vld [vmem:[#allocation4 + $0xe8] sm:$0xff] }
  0x2c   :  { %379 = vmatprep.subr.mxu1 %v523_v0  ;;  %410 = vmatprep.subr.mxu0 %v523_v0  ;;  %v81_v23 = vld [vmem:[#allocation4 + $0xe0] sm:$0xff]  ;;  %v80_v24 = vld [vmem:[#allocation4 + $0xd8] sm:$0xff]  ;;  %v79_v25 = vld [vmem:[#allocation4 + $0xd0] sm:$0xff] }
  0x2d   :  { %380 = vmatpush3.msra.mxu1 %v66_v6  ;;  %411 = vmatpush3.msra.mxu0 %v84_v20  ;;  %v78_v26 = vld [vmem:[#allocation4 + $0xc8] sm:$0xff]  ;;  %v77_v27 = vld [vmem:[#allocation4 + $0xc0] sm:$0xff]  ;;  %v76_v28 = vld [vmem:[#allocation4 + $0xb8] sm:$0xff] }
  0x2e   :  { %381 = vmatprep.subr.mxu1 %v523_v0  ;;  %412 = vmatprep.subr.mxu0 %v523_v0  ;;  %v75_v29 = vld [vmem:[#allocation4 + $0xb0] sm:$0xff]  ;;  %v74_v30 = vld [vmem:[#allocation4 + $0xa8] sm:$0xff]  ;;  %v73_v31 = vld [vmem:[#allocation4 + $0xa0] sm:$0xff] }
  0x2f   :  { %382 = vmatpush3.msra.mxu1 %v65_v7  ;;  %413 = vmatpush3.msra.mxu0 %v83_v21  ;;  %v52_v35 = vld [vmem:[#allocation6] sm:$0x7]  ;;  %v72_v41 = vld [vmem:[#allocation4 + $0x98] sm:$0xff]  ;;  %v71_v42 = vld [vmem:[#allocation4 + $0x90] sm:$0xff] }
  0x30   :  { %383 = vmatprep.subr.mxu1 %v523_v0  ;;  %414 = vmatprep.subr.mxu0 %v523_v0  ;;  %v89_v36 = vrot.slane %v52_v35, %v88_v34  ;;  %v70_v43 = vld [vmem:[#allocation4 + $0x88] sm:$0xff]  ;;  %v168_v45 = vrot.slane %v52_v35, %v167_v44  ;;  %v243_v51 = vrot.slane %v52_v35, %v242_v50 }
  0x31   :  { %384 = vmatpush3.msra.mxu1 %v64_v8  ;;  %415 = vmatpush3.msra.mxu0 %v82_v22 }
  0x32   :  { %385 = vmatprep.subr.mxu1 %v523_v0  ;;  %416 = vmatprep.subr.mxu0 %v523_v0 }
  0x33   :  { %386 = vmatpush3.msra.mxu1 %v63_v9  ;;  %417 = vmatpush3.msra.mxu0 %v81_v23 }
  0x34   :  { %387 = vmatprep.subr.mxu1 %v523_v0  ;;  %418 = vmatprep.subr.mxu0 %v523_v0 }
  0x35   :  { %388 = vmatpush3.msra.mxu1 %v62_v10  ;;  %419 = vmatpush3.msra.mxu0 %v80_v24 }
  0x36   :  { %389 = vmatprep.subr.mxu1 %v523_v0  ;;  %420 = vmatprep.subr.mxu0 %v523_v0 }
  0x37   :  { %390 = vmatpush3.msra.mxu1 %v61_v11  ;;  %421 = vmatpush3.msra.mxu0 %v79_v25 }
  0x38   :  { %391 = vmatprep.subr.mxu1 %v523_v0  ;;  %422 = vmatprep.subr.mxu0 %v523_v0 }
  0x39   :  { %392 = vmatpush3.msra.mxu1 %v60_v12  ;;  %423 = vmatpush3.msra.mxu0 %v78_v26 }
  0x3a   :  { %393 = vmatprep.subr.mxu1 %v523_v0  ;;  %424 = vmatprep.subr.mxu0 %v523_v0 }
  0x3b   :  { %394 = vmatpush3.msra.mxu1 %v59_v13  ;;  %425 = vmatpush3.msra.mxu0 %v77_v27 }
  0x3c   :  { %395 = vmatprep.subr.mxu1 %v523_v0  ;;  %426 = vmatprep.subr.mxu0 %v523_v0 }
  0x3d   :  { %396 = vmatpush3.msra.mxu1 %v58_v14  ;;  %427 = vmatpush3.msra.mxu0 %v76_v28 }
  0x3e   :  { %397 = vmatprep.subr.mxu1 %v523_v0  ;;  %428 = vmatprep.subr.mxu0 %v523_v0 }
  0x3f   :  { %398 = vmatpush3.msra.mxu1 %v57_v15  ;;  %429 = vmatpush3.msra.mxu0 %v75_v29 }
  0x40   :  { %399 = vmatprep.subr.mxu1 %v523_v0  ;;  %430 = vmatprep.subr.mxu0 %v523_v0 }
  0x41   :  { %400 = vmatpush3.msra.mxu1 %v56_v16  ;;  %431 = vmatpush3.msra.mxu0 %v74_v30 }
  0x42   :  { %401 = vmatprep.subr.mxu1 %v523_v0  ;;  %432 = vmatprep.subr.mxu0 %v523_v0 }
  0x43   :  { %402 = vmatpush3.msra.mxu1 %v55_v17  ;;  %433 = vmatpush3.msra.mxu0 %v73_v31 }
  0x44   :  { %403 = vmatprep.subr.mxu1 %v523_v0  ;;  %434 = vmatprep.subr.mxu0 %v523_v0 }
  0x45   :  { %404 = vmatpush3.msra.mxu1 %v54_v18  ;;  %435 = vmatpush3.msra.mxu0 %v72_v41 }
  0x46   :  { %436 = vmatprep.subr.mxu0 %v523_v0 }
  0x47   :  { %437 = vmatpush3.msra.mxu0 %v71_v42 }
  0x48   :  { %438 = vmatprep.subr.mxu0 %v523_v0 }
  0x49   :  { %439 = vmatpush3.msra.mxu0 %v70_v43 }
  0xe8   :  { %v160_v37 = vpop.f32.mrf.mxu0 }
  0xe9   :  { %v161_v38 = vadd.f32 %v160_v37, %v89_v36 }
  0xea   :  { %v372_v39 = vpop.f32.mrf.mxu0 }
  0xeb   :  { %v164_v40 = vmax.f32 %v161_v38, 0.0 }
  0xed   :  { %406 = vmatmul.mubr.f32.vlgmr.msra.gmra.mxu1 %v164_v40 }
 0x1ad   :  { %v235_v46 = vpop.f32.mrf.mxu1 }
 0x1ae   :  { %v236_v47 = vadd.f32 %v235_v46, %v168_v45 }
 0x1af   :  { %v407_v48 = vpop.f32.mrf.mxu1 }
 0x1b0   :  { %v239_v49 = vmax.f32 %v236_v47, 0.0 }
 0x1b2   :  { %441 = vmatmul.mubr.f32.vlgmr.msra.gmra.mxu0 %v239_v49 }
 0x272   :  { %v310_v52 = vpop.f32.mrf.mxu0 }
 0x273   :  { %v311_v53 = vadd.f32 %v310_v52, %v243_v51 }
 0x274   :  { %v442_v54 = vpop.f32.mrf.mxu0 }
 0x275   :  { %314 = vmax.xlane.f32.xlu0 %v311_v53 }
 0x2fe   :  { %v315_v55 = vpop.xlane.xlu0 %314 }
 0x2ff   :  { %v316_v56 = vsub.f32 %v311_v53, %v315_v55 }
 0x301   :  { %v317_v57 = vmul.f32 1.442695, %v316_v56 }
 0x303   :  { %450 = vpow2.f32 %v317_v57 }
 0x310   :  { %v451_v58 = vpop.eup %450 }
 0x311   :  { %319 = vadd.xlane.f32.xlu0 %v451_v58 }
 0x39a   :  { %v320_v59 = vpop.xlane.xlu0 %319 }
 0x39b   :  { %452 = vrcp.f32 %v320_v59 }
 0x3a8   :  { %v453_v60 = vpop.eup %452 }
 0x3a9   :  { %v322_v61 = vmul.f32 %v453_v60, %v451_v58 }
 0x3ab   :  { %324 = vst.msk [vmem:[%s599_s3] sm:$0xff] %vm323_vm2, %v322_v61 }
 0x3ac   :  { %329 = vsyncpa [#allocation3], 1 }
 0x3ad   :  { %330 = vsyncpa [#allocation5], 1 }

</bundles_post_ra>
